<compile_context>
chip_gen: v6e
topology: v6e:2x2x1
jax: 0.10.0
libtpu: 0.0.40
codegen_flags: <defaults>
</compile_context>

<pallas_src>
import functools

import jax
import jax.numpy as jnp
from jax.experimental import pallas as pl
from jax.experimental.pallas import tpu as pltpu


def _round_up(x, m):
    return (x + m - 1) // m * m


def logu_mlp_kernel(xT_ref, w1_ref, b1_ref, w2_ref, b2_ref, w3_ref, b3_ref,
                    oT_ref):
    """Fused 3-layer MLP, batch-on-lanes layout.

    xT_ref : [nS, Bt]   (batch tile on the 128-lane axis)
    w*_ref : [out, in]  (torch nn.Linear layout -> no transpose needed)
    b*_ref : [out, 1]   (f32, broadcast across lanes)
    oT_ref : [nA, Bt]
    """
    xT = xT_ref[...]
    # MXU matmuls with f32 accumulation; bias adds / ReLUs stay f32 on the VPU
    # (works on v5e too, which has no bf16 VPU path).
    h1 = jnp.dot(w1_ref[...], xT, preferred_element_type=jnp.float32) + b1_ref[...]
    h1 = jnp.maximum(h1, 0.0).astype(w2_ref.dtype)
    h2 = jnp.dot(w2_ref[...], h1, preferred_element_type=jnp.float32) + b2_ref[...]
    h2 = jnp.maximum(h2, 0.0).astype(w3_ref.dtype)
    out = jnp.dot(w3_ref[...], h2, preferred_element_type=jnp.float32) + b3_ref[...]
    oT_ref[...] = out.astype(oT_ref.dtype)


def _resident_spec(shape):
    # Constant index_map -> operand identical across all grid steps; a single
    # VMEM buffer suffices (double-buffering it would be pure VMEM waste).
    return pl.BlockSpec(shape, lambda i: (0, 0), pipeline_mode=pl.Buffered(1))


def prepare_params(w1, b1, w2, b2, w3, b3, matmul_dtype=jnp.float32):
    """One-time parameter prep (hoisted out of the per-call forward path).

    Inputs use torch nn.Linear layout: w_i is [out, in], b_i is [out].
    Returns kernel-ready arrays: weights cast to matmul_dtype, biases as
    [out, 1] float32 (so they broadcast across the lane/batch axis in-kernel).
    """
    md = jnp.dtype(matmul_dtype)
    return (
        w1.astype(md), b1.reshape(-1, 1).astype(jnp.float32),
        w2.astype(md), b2.reshape(-1, 1).astype(jnp.float32),
        w3.astype(md), b3.reshape(-1, 1).astype(jnp.float32),
    )


def _choose_tiling(B, block_b):
    """Pick a lane-granular batch tile and the padded batch size."""
    B_min = _round_up(B, 128)                       # lane granularity
    bb = _round_up(max(128, min(block_b, B_min)), 128)
    # v7x has 2 TensorCores: when the batch spans >= 2 lane tiles, keep the
    # grid at >= 2 steps so "parallel" semantics can shard it.  Small batches
    # stay single-step (no pointless per-step overhead on single-TC chips).
    if B_min >= 256 and bb >= B_min:
        bb = _round_up(B_min // 2, 128)
    B_pad = _round_up(B, bb)
    return bb, B_pad


@functools.partial(jax.jit, static_argnames=("block_b",))
def logu_forward(x, w1, b1, w2, b2, w3, b3, *, block_b=256):
    """x: [B, nS] float; w_i: [out, in] (prepared); b_i: [out, 1] f32."""
    B, nS = x.shape
    H = w1.shape[0]
    nA = w3.shape[0]
    md = w1.dtype
    itemsize = jnp.dtype(md).itemsize

    block_b, B_pad = _choose_tiling(B, block_b)
    grid = (B_pad // block_b,)

    # Layout plumbing only: transpose/cast/pad the (small) activation stream.
    xT = x.T.astype(md)                              # [nS, B]
    if B_pad != B:
        xT = jnp.pad(xT, ((0, 0), (0, B_pad - B)))   # ragged batch -> full tiles

    flops = 2 * B_pad * (nS * H + H * H + H * nA)
    bytes_accessed = (
        B_pad * nS * itemsize                        # streamed x^T
        + (H * nS + H * H + nA * H) * itemsize       # resident weights
        + (2 * H + nA) * 4                           # biases (f32)
        + B_pad * nA * 4                             # output (unpadded head!)
    )

    # VMEM guard: only raise the scoped limit if the resident weights plus
    # pipeline buffers would not fit the 32 MiB default (v7x has 64 MiB total).
    vmem_est = (
        2 * nS * block_b * itemsize                  # x^T tiles (double-buffered)
        + 2 * nA * block_b * 4                       # out^T tiles (double-buffered)
        + (H * nS + H * H + nA * H) * itemsize       # resident weights
        + (2 * H + nA) * 128 * 4                     # biases (lane-padded f32)
        + 2 * H * block_b * 4                        # h1/h2 f32 intermediates
    )
    vmem_limit = None
    if 2 * vmem_est > 32 * 1024 * 1024:
        vmem_limit = min(64 * 1024 * 1024, 2 * vmem_est)

    outT = pl.pallas_call(
        logu_mlp_kernel,
        out_shape=jax.ShapeDtypeStruct((nA, B_pad), jnp.float32),
        grid_spec=pltpu.PrefetchScalarGridSpec(
            num_scalar_prefetch=0,
            grid=grid,
            in_specs=[
                pl.BlockSpec((nS, block_b), lambda i: (0, i)),  # x^T (streamed)
                _resident_spec((H, nS)),                        # W1
                _resident_spec((H, 1)),                         # b1
                _resident_spec((H, H)),                         # W2
                _resident_spec((H, 1)),                         # b2
                _resident_spec((nA, H)),                        # W3
                _resident_spec((nA, 1)),                        # b3
            ],
            out_specs=pl.BlockSpec((nA, block_b), lambda i: (0, i)),
        ),
        compiler_params=pltpu.CompilerParams(
            # Batch axis is embarrassingly parallel -> sharded across
            # TensorCores (v7x dual-core) whenever the grid has >= 2 steps.
            dimension_semantics=("parallel",),
            vmem_limit_bytes=vmem_limit,
        ),
        cost_estimate=pl.CostEstimate(
            flops=flops, transcendentals=0, bytes_accessed=bytes_accessed),
    )(xT, w1, b1, w2, b2, w3, b3)

    # Drop batch padding, back to [B, nA].
    return outT[:, :B].T


def init_linear_params(key, fan_in, fan_out):
    # torch.nn.Linear default init: U(-1/sqrt(fan_in), 1/sqrt(fan_in)),
    # weight stored as [out, in], bias as [out].
    kw, kb = jax.random.split(key)
    bound = 1.0 / (fan_in ** 0.5)
    w = jax.random.uniform(kw, (fan_out, fan_in), jnp.float32, -bound, bound)
    b = jax.random.uniform(kb, (fan_out,), jnp.float32, -bound, bound)
    return w, b


def reference_forward(x, w1, b1, w2, b2, w3, b3):
    # Pure-JAX reference in torch layout: relu(relu(x@W1^T+b1)@W2^T+b2)@W3^T+b3.
    h1 = jnp.maximum(x @ w1.T + b1, 0.0)
    h2 = jnp.maximum(h1 @ w2.T + b2, 0.0)
    return h2 @ w3.T + b3


if __name__ == "__main__":
    # Small shapes consistent with the module: nS (obs dim), hidden_dim, nA.
    nS, H, nA = 16, 32, 4

    key = jax.random.PRNGKey(0)
    kx1, kx2, k1, k2, k3 = jax.random.split(key, 5)

    w1, b1 = init_linear_params(k1, nS, H)
    w2, b2 = init_linear_params(k2, H, H)
    w3, b3 = init_linear_params(k3, nA, H)[0].shape and init_linear_params(k3, H, nA)
    params = prepare_params(w1, b1, w2, b2, w3, b3)  # f32 matmul path (exact vs ref)

    # Case 1: tiny ragged batch (B=20) -> single-step grid, no artificial split.
    x_small = jax.random.normal(kx1, (20, nS), jnp.float32)
    out_small = jax.block_until_ready(logu_forward(x_small, *params))
    ref_small = reference_forward(x_small, w1, b1, w2, b2, w3, b3)
    assert out_small.shape == (20, nA)
    assert jnp.allclose(out_small, ref_small, atol=1e-4, rtol=1e-4), "mismatch (B=20)"

    # Case 2: batch spanning 2 lane tiles (B=200) -> ragged pad + 2-step
    # parallel grid (exercises the multi-step / dual-TC path).
    x_big = jax.random.normal(kx2, (200, nS), jnp.float32)
    out_big = jax.block_until_ready(logu_forward(x_big, *params))
    ref_big = reference_forward(x_big, w1, b1, w2, b2, w3, b3)
    assert out_big.shape == (200, nA)
    assert jnp.allclose(out_big, ref_big, atol=1e-4, rtol=1e-4), "mismatch (B=200)"

    print("KERNEL_OK")
</pallas_src>

<mosaic_0001>
module attributes {stable_mosaic.version = 11 : i64} {
  func.func @logu_mlp_kernel(%arg0: i32, %arg1: memref<16x128xf32, #tpu.memory_space<vmem>>, %arg2: memref<32x16xf32, #tpu.memory_space<vmem>>, %arg3: memref<32x1xf32, #tpu.memory_space<vmem>>, %arg4: memref<32x32xf32, #tpu.memory_space<vmem>>, %arg5: memref<32x1xf32, #tpu.memory_space<vmem>>, %arg6: memref<4x32xf32, #tpu.memory_space<vmem>>, %arg7: memref<4x1xf32, #tpu.memory_space<vmem>>, %arg8: memref<4x128xf32, #tpu.memory_space<vmem>>) attributes {dimension_semantics = [#tpu.dimension_semantics<parallel>], iteration_bounds = array<i64: 1>, scalar_prefetch = 0 : i64, scratch_operands = 0 : i64, tpu.core_type = #tpu.core_type<tc>, window_params = [{transform_indices = @transform_0, window_bounds = array<i64: 16, 128>}, {pipeline_mode = #tpu.pipeline_mode<synchronous>, transform_indices = @transform_1, window_bounds = array<i64: 32, 16>}, {pipeline_mode = #tpu.pipeline_mode<synchronous>, transform_indices = @transform_2, window_bounds = array<i64: 32, 1>}, {pipeline_mode = #tpu.pipeline_mode<synchronous>, transform_indices = @transform_3, window_bounds = array<i64: 32, 32>}, {pipeline_mode = #tpu.pipeline_mode<synchronous>, transform_indices = @transform_4, window_bounds = array<i64: 32, 1>}, {pipeline_mode = #tpu.pipeline_mode<synchronous>, transform_indices = @transform_5, window_bounds = array<i64: 4, 32>}, {pipeline_mode = #tpu.pipeline_mode<synchronous>, transform_indices = @transform_6, window_bounds = array<i64: 4, 1>}, {transform_indices = @transform_7, window_bounds = array<i64: 4, 128>}]} {
    %c0 = arith.constant 0 : index
    %c0_0 = arith.constant 0 : index
    %0 = vector.load %arg1[%c0, %c0_0] : memref<16x128xf32, #tpu.memory_space<vmem>>, vector<16x128xf32>
    %c0_1 = arith.constant 0 : index
    %c0_2 = arith.constant 0 : index
    %1 = vector.load %arg2[%c0_1, %c0_2] : memref<32x16xf32, #tpu.memory_space<vmem>>, vector<32x16xf32>
    %cst = arith.constant dense<0.000000e+00> : vector<32x128xf32>
    %2 = tpu.matmul %1, %0, %cst {dimension_numbers = #tpu.dot_dimension_numbers<[1], [0], [0], [1], [0, 0, 1, 1], [], []>} : vector<32x16xf32>, vector<16x128xf32>, vector<32x128xf32> -> vector<32x128xf32>
    %c0_3 = arith.constant 0 : index
    %c0_4 = arith.constant 0 : index
    %3 = vector.load %arg3[%c0_3, %c0_4] : memref<32x1xf32, #tpu.memory_space<vmem>>, vector<32x1xf32>
    %4 = vector.broadcast %3 : vector<32x1xf32> to vector<32x128xf32>
    %5 = arith.addf %2, %4 : vector<32x128xf32>
    %cst_5 = arith.constant 0.000000e+00 : f32
    %6 = vector.broadcast %cst_5 : f32 to vector<32x128xf32>
    %7 = arith.maximumf %5, %6 : vector<32x128xf32>
    %c0_6 = arith.constant 0 : index
    %c0_7 = arith.constant 0 : index
    %8 = vector.load %arg4[%c0_6, %c0_7] : memref<32x32xf32, #tpu.memory_space<vmem>>, vector<32x32xf32>
    %cst_8 = arith.constant dense<0.000000e+00> : vector<32x128xf32>
    %9 = tpu.matmul %8, %7, %cst_8 {dimension_numbers = #tpu.dot_dimension_numbers<[1], [0], [0], [1], [0, 0, 1, 1], [], []>} : vector<32x32xf32>, vector<32x128xf32>, vector<32x128xf32> -> vector<32x128xf32>
    %c0_9 = arith.constant 0 : index
    %c0_10 = arith.constant 0 : index
    %10 = vector.load %arg5[%c0_9, %c0_10] : memref<32x1xf32, #tpu.memory_space<vmem>>, vector<32x1xf32>
    %11 = vector.broadcast %10 : vector<32x1xf32> to vector<32x128xf32>
    %12 = arith.addf %9, %11 : vector<32x128xf32>
    %cst_11 = arith.constant 0.000000e+00 : f32
    %13 = vector.broadcast %cst_11 : f32 to vector<32x128xf32>
    %14 = arith.maximumf %12, %13 : vector<32x128xf32>
    %c0_12 = arith.constant 0 : index
    %c0_13 = arith.constant 0 : index
    %15 = vector.load %arg6[%c0_12, %c0_13] : memref<4x32xf32, #tpu.memory_space<vmem>>, vector<4x32xf32>
    %cst_14 = arith.constant dense<0.000000e+00> : vector<4x128xf32>
    %16 = tpu.matmul %15, %14, %cst_14 {dimension_numbers = #tpu.dot_dimension_numbers<[1], [0], [0], [1], [0, 0, 1, 1], [], []>} : vector<4x32xf32>, vector<32x128xf32>, vector<4x128xf32> -> vector<4x128xf32>
    %c0_15 = arith.constant 0 : index
    %c0_16 = arith.constant 0 : index
    %17 = vector.load %arg7[%c0_15, %c0_16] : memref<4x1xf32, #tpu.memory_space<vmem>>, vector<4x1xf32>
    %18 = vector.broadcast %17 : vector<4x1xf32> to vector<4x128xf32>
    %19 = arith.addf %16, %18 : vector<4x128xf32>
    %c0_17 = arith.constant 0 : index
    %c0_18 = arith.constant 0 : index
    %20 = vector.load %arg8[%c0_17, %c0_18] : memref<4x128xf32, #tpu.memory_space<vmem>>, vector<4x128xf32>
    tpu.vector_store %arg8[%c0_17, %c0_18], %19 {strides = array<i32>} : memref<4x128xf32, #tpu.memory_space<vmem>>, vector<4x128xf32>,
    return
  }
  func.func @transform_0(%arg0: i32) -> (i32, i32) {
    %c0_i32 = arith.constant 0 : i32
    %c0_i32_0 = arith.constant 0 : i32
    return %c0_i32, %arg0 : i32, i32
  }
  func.func @transform_1(%arg0: i32) -> (i32, i32) {
    %c0_i32 = arith.constant 0 : i32
    %c0_i32_0 = arith.constant 0 : i32
    %c0_i32_1 = arith.constant 0 : i32
    return %c0_i32, %c0_i32_0 : i32, i32
  }
  func.func @transform_2(%arg0: i32) -> (i32, i32) {
    %c0_i32 = arith.constant 0 : i32
    %c0_i32_0 = arith.constant 0 : i32
    %c0_i32_1 = arith.constant 0 : i32
    return %c0_i32, %c0_i32_0 : i32, i32
  }
  func.func @transform_3(%arg0: i32) -> (i32, i32) {
    %c0_i32 = arith.constant 0 : i32
    %c0_i32_0 = arith.constant 0 : i32
    %c0_i32_1 = arith.constant 0 : i32
    return %c0_i32, %c0_i32_0 : i32, i32
  }
  func.func @transform_4(%arg0: i32) -> (i32, i32) {
    %c0_i32 = arith.constant 0 : i32
    %c0_i32_0 = arith.constant 0 : i32
    %c0_i32_1 = arith.constant 0 : i32
    return %c0_i32, %c0_i32_0 : i32, i32
  }
  func.func @transform_5(%arg0: i32) -> (i32, i32) {
    %c0_i32 = arith.constant 0 : i32
    %c0_i32_0 = arith.constant 0 : i32
    %c0_i32_1 = arith.constant 0 : i32
    return %c0_i32, %c0_i32_0 : i32, i32
  }
  func.func @transform_6(%arg0: i32) -> (i32, i32) {
    %c0_i32 = arith.constant 0 : i32
    %c0_i32_0 = arith.constant 0 : i32
    %c0_i32_1 = arith.constant 0 : i32
    return %c0_i32, %c0_i32_0 : i32, i32
  }
  func.func @transform_7(%arg0: i32) -> (i32, i32) {
    %c0_i32 = arith.constant 0 : i32
    %c0_i32_0 = arith.constant 0 : i32
    return %c0_i32, %arg0 : i32, i32
  }
}

</mosaic_0001>

<bundles_post_ra>
// kernel: logu_forward.1
= control target key start
LH: loop header
LB: loop body
LE: loop exit
PB: predicated region body
PF: predicated region fallthrough
CT: control target
= control target key end

     0   :  { %vm56_vm0 = vcmask 130048   ;;  %v441_v3 = vmov 0   ;;  %vm186_vm1 = vcmask 261120   ;;  %v442_v36 = vmov 0.0   ;;  %s556_s0 = inlined_call_operand.vmem [shape: f32[16,128], index: 0, kind: input, shape index: {}]   ;;  %s557_s1 = inlined_call_operand.vmem [shape: f32[32,16], index: 1, kind: input, shape index: {}]   ;;  %s558_s2 = inlined_call_operand.vmem [shape: f32[32,1], index: 2, kind: input, shape index: {}]   ;;  %s559_s4 = inlined_call_operand.vmem [shape: f32[32,1], index: 4, kind: input, shape index: {}]   ;;  %s560_s6 = inlined_call_operand.vmem [shape: f32[4,1], index: 6, kind: input, shape index: {}]   ;;  %s561_s3 = inlined_call_operand.vmem [shape: f32[32,32], index: 3, kind: input, shape index: {}]   ;;  %s562_s5 = inlined_call_operand.vmem [shape: f32[4,32], index: 5, kind: input, shape index: {}]   ;;  %s563_s7 = inlined_call_operand.vmem [shape: f32[4,128], index: 7, kind: output, shape index: {}]  }
   0x1   :  { %v27_v0 = vld [vmem:[%s556_s0 + $0x8] sm:$0xff]  ;;  %v26_v1 = vld [vmem:[%s556_s0] sm:$0xff]  ;;  %439 = vset.pattern.permute.xlu0 %v441_v3  ;;  %440 = vset.pattern.permute.xlu1 %v441_v3  ;;  %v35_v5 = vld [vmem:[%s558_s2 + $0x18] sm:$0xff]  ;;  %vm443_vm2 = vmmov 0  }
   0x2   :  { %v28_v2 = vld [vmem:[%s557_s1] sm:$0xff]  ;;  %401 = vmatprep.subr.mxu0 %v27_v0  ;;  %v29_v4 = vld [vmem:[%s557_s1 + $0x8] sm:$0xff]  ;;  %v30_v6 = vld [vmem:[%s557_s1 + $0x10] sm:$0xff]  ;;  %53 = vperm.xlu0 %439, %v35_v5  }
   0x3   :  { %405 = vmatprep.mubr.msk.f32.mxu0 %vm56_vm0, %v28_v2  ;;  %402 = vmatpush3.msra.mxu0 %v27_v0  ;;  %v33_v7 = vld [vmem:[%s558_s2 + $0x8] sm:$0xff]  ;;  %v34_v8 = vld [vmem:[%s558_s2 + $0x10] sm:$0xff]  ;;  %v32_v9 = vld [vmem:[%s558_s2] sm:$0xff] }
   0x4   :  { %403 = vmatprep.subr.mxu0 %v26_v1  ;;  %43 = vperm.xlu1 %440, %v33_v7   ;;  %v31_v10 = vld [vmem:[%s557_s1 + $0x18] sm:$0xff]  ;;  %v164_v12 = vld [vmem:[%s559_s4 + $0x10] sm:$0xff]  ;;  %v163_v13 = vld [vmem:[%s559_s4 + $0x8] sm:$0xff] }
   0x5   :  { %404 = vmatpush3.msra.mxu0 %v26_v1  ;;  %v165_v11 = vld [vmem:[%s559_s4 + $0x18] sm:$0xff]  ;;  %v162_v14 = vld [vmem:[%s559_s4] sm:$0xff]  ;;  %v159_v33 = vld [vmem:[%s561_s3 + $0x8] sm:$0xff] }
   0x6   :  { %406 = vmatmul.mubr.msk.f32.vlgmr.msra.gmra.mxu0 %vm56_vm0, %v29_v4  ;;  %48 = vperm.xlu0 %439, %v34_v8   ;;  %v289_v15 = vld [vmem:[%s560_s6] sm:$0xf]  ;;  %v160_v34 = vld [vmem:[%s561_s3 + $0x10] sm:$0xff]  ;;  %v161_v35 = vld [vmem:[%s561_s3 + $0x18] sm:$0xff] }
   0x7   :  { %408 = vmatprep.mubr.msk.f32.mxu0 %vm56_vm0, %v30_v6  ;;  %v158_v16 = vld [vmem:[%s561_s3] sm:$0xff]  ;;  %425 = vmatprep.subr.mxu0 %v442_v36 }
   0x8   :  { %38 = vperm.xlu1 %440, %v32_v9   ;;  %419 = vmatprep.mubr.msk.f32.mxu1 %vm186_vm1, %v158_v16  ;;  %v288_v53 = vld [vmem:[%s562_s5] sm:$0xf] }
   0xa   :  { %409 = vmatmul.mubr.msk.f32.gmra.mxu0 %vm56_vm0, %v31_v10  ;;  %183 = vperm.xlu0 %439, %v165_v11  }
   0xb   :  { %433 = vmatprep.mubr.msk.f32.mxu0 %vm443_vm2, %v442_v36 }
   0xc   :  { %178 = vperm.xlu1 %440, %v164_v12  }
   0xe   :  { %173 = vperm.xlu0 %439, %v163_v13  }
  0x10   :  { %168 = vperm.xlu1 %440, %v162_v14  }
  0x12   :  { %292 = vperm.xlu0 %439, %v289_v15  }
  0x7d   :  { %v54_v17 = vpop.permute.xlu0 %53 }
  0x7f   :  { %v44_v19 = vpop.permute.xlu1 %43 }
  0x81   :  { %v49_v23 = vpop.permute.xlu0 %48 }
  0x83   :  { %v39_v28 = vpop.permute.xlu1 %38 }
  0x85   :  { %v184_v37 = vpop.permute.xlu0 %183 }
  0x87   :  { %v179_v39 = vpop.permute.xlu1 %178 }
  0x89   :  { %v174_v43 = vpop.permute.xlu0 %173 }
  0x8b   :  { %v169_v48 = vpop.permute.xlu1 %168 }
  0x8d   :  { %v293_v54 = vpop.permute.xlu0 %292 }
  0xc6   :  { %v407_v18 = vpop.f32.mrf.mxu0 }
  0xc7   :  { %v141_v25 = vadd.f32 %v407_v18, %v44_v19 }
  0xc8   :  { %v135_v20 = vpop.f32.mrf.mxu0 }
  0xc9   :  { %v136_v29 = vadd.f32 %v135_v20, %v39_v28  ;;  %v155_v31 = vmax.f32 %v141_v25, 0.0 }
  0xca   :  { %v410_v21 = vpop.f32.mrf.mxu0 }
  0xcb   :  { %v151_v22 = vadd.f32 %v410_v21, %v54_v17  ;;  %v154_v32 = vmax.f32 %v136_v29, 0.0 }
  0xcc   :  { %v145_v24 = vpop.f32.mrf.mxu0 }
  0xcd   :  { %v157_v26 = vmax.f32 %v151_v22, 0.0  ;;  %v146_v27 = vadd.f32 %v145_v24, %v49_v23 }
  0xcf   :  { %v156_v30 = vmax.f32 %v146_v27, 0.0  ;;  %411 = vmatprep.subr.mxu1 %v157_v26 }
  0xd0   :  { %412 = vmatpush3.msra.mxu1 %v157_v26 }
  0xd1   :  { %413 = vmatprep.subr.mxu1 %v156_v30 }
  0xd2   :  { %414 = vmatpush3.msra.mxu1 %v156_v30 }
  0xd3   :  { %415 = vmatprep.subr.mxu1 %v155_v31 }
  0xd4   :  { %416 = vmatpush3.msra.mxu1 %v155_v31 }
  0xd5   :  { %417 = vmatprep.subr.mxu1 %v154_v32 }
  0xd6   :  { %418 = vmatpush3.msra.mxu1 %v154_v32 }
  0xd7   :  { %420 = vmatmul.mubr.msk.f32.vlgmr.msra.gmra.mxu1 %vm186_vm1, %v159_v33 }
  0xd8   :  { %422 = vmatprep.mubr.msk.f32.mxu1 %vm186_vm1, %v160_v34 }
  0xdb   :  { %423 = vmatmul.mubr.msk.f32.gmra.mxu1 %vm186_vm1, %v161_v35 }
 0x197   :  { %v421_v38 = vpop.f32.mrf.mxu1 }
 0x198   :  { %v271_v45 = vadd.f32 %v421_v38, %v174_v43 }
 0x199   :  { %v265_v40 = vpop.f32.mrf.mxu1 }
 0x19a   :  { %v266_v49 = vadd.f32 %v265_v40, %v169_v48  ;;  %v285_v51 = vmax.f32 %v271_v45, 0.0 }
 0x19b   :  { %v424_v41 = vpop.f32.mrf.mxu1 }
 0x19c   :  { %v281_v42 = vadd.f32 %v424_v41, %v184_v37  ;;  %v284_v52 = vmax.f32 %v266_v49, 0.0 }
 0x19d   :  { %v275_v44 = vpop.f32.mrf.mxu1 }
 0x19e   :  { %v287_v46 = vmax.f32 %v281_v42, 0.0  ;;  %v276_v47 = vadd.f32 %v275_v44, %v179_v39 }
 0x1a0   :  { %v286_v50 = vmax.f32 %v276_v47, 0.0  ;;  %426 = vmatpush3.msra.mxu0 %v287_v46 }
 0x1a1   :  { %427 = vmatprep.subr.mxu0 %v442_v36 }
 0x1a2   :  { %428 = vmatpush3.msra.mxu0 %v286_v50 }
 0x1a3   :  { %429 = vmatprep.subr.mxu0 %v442_v36 }
 0x1a4   :  { %430 = vmatpush3.msra.mxu0 %v285_v51 }
 0x1a5   :  { %431 = vmatprep.subr.mxu0 %v442_v36 }
 0x1a6   :  { %432 = vmatpush3.msra.mxu0 %v284_v52 }
 0x1a7   :  { %434 = vmatmul.mubr.msk.f32.vlgmr.msra.gmra.mxu0 %vm186_vm1, %v288_v53 }
 0x267   :  { %v364_v55 = vpop.f32.mrf.mxu0 }
 0x268   :  { %v365_v56 = vadd.f32 %v364_v55, %v293_v54 }
 0x269   :  { %v435_v57 = vpop.f32.mrf.mxu0 }
 0x26a   :  { %368 = vst [vmem:[%s563_s7] sm:$0xf] %v365_v56 }

</bundles_post_ra>
